<compile_context>
chip_gen: v5e
topology: v5e:2x2
jax: 0.10.0
libtpu: 0.0.40
codegen_flags: <defaults>
</compile_context>

<pallas_src>
import functools
import math

import jax
import jax.numpy as jnp
from jax.experimental import pallas as pl
from jax.experimental.pallas import tpu as pltpu


def _round_up(v, m):
    return ((v + m - 1) // m) * m


def _pad_to(a, shape):
    """Zero-pad `a` (same rank) up to `shape`; no-op when already aligned."""
    if tuple(a.shape) == tuple(shape):
        return a
    return jnp.pad(a, [(0, s - d) for d, s in zip(a.shape, shape)])


def _graph_conv_kernel(xw_first, has_bias, *refs):
    # refs: adj_ref (TM, Nk), x_ref (Nk, Kp), w_ref (Kp, Fp), [b_ref (1, Fp)],
    #       o_ref (TM, Fp).  Operands are in compute dtype (bf16 by default);
    #       both matmuls accumulate in f32; output tile is a single lane-dense
    #       unmasked f32 store.
    if has_bias:
        adj_ref, x_ref, w_ref, b_ref, o_ref = refs
    else:
        adj_ref, x_ref, w_ref, o_ref = refs
        b_ref = None
    if xw_first:
        # x @ w first: cheaper when num_out < num_in (shrinks the N^2 matmul
        # and the f32 intermediate from (TM, Kp) to (Nk, Fp)).
        xw = jnp.dot(x_ref[...], w_ref[...], preferred_element_type=jnp.float32)
        y = jnp.dot(adj_ref[...], xw.astype(adj_ref.dtype),
                    preferred_element_type=jnp.float32)
    else:
        ax = jnp.dot(adj_ref[...], x_ref[...], preferred_element_type=jnp.float32)
        y = jnp.dot(ax.astype(w_ref.dtype), w_ref[...],
                    preferred_element_type=jnp.float32)
    if b_ref is not None:
        y = y + b_ref[...]
    o_ref[...] = y.astype(o_ref.dtype)


def prepare_graph_conv(weight, adj, bias=None, *, row_tile=256,
                       compute_dtype=jnp.bfloat16,
                       vmem_budget_bytes=40 * 2**20):
    """Pad/cast the constant operands ONCE (call at model init, not per forward).

    weight: (num_in, num_out);  bias: (num_out,) or None
    adj:    (N, N) shared across the batch, or (B, N, N)
    Returns a params dict consumed by graph_conv_forward().
    """
    K, F = weight.shape
    batched_adj = adj.ndim == 3
    N = adj.shape[-1]
    assert adj.shape[-2:] == (N, N), "adjacency must be (..., N, N)"

    Nk = _round_up(N, 128)   # adj lane dim / matmul-1 contraction (lane-dense)
    Kp = _round_up(K, 128)   # x lane dim / matmul-2 contraction
    Fp = _round_up(F, 128)   # output lane dim
    xw_first = F < K         # pick the cheaper matmul association

    bc = jnp.dtype(compute_dtype).itemsize

    def working_set(tm):
        ws = bc * (2 * tm * Nk      # adj tile, double-buffered
                   + 2 * Nk * Kp    # x block, double-buffered
                   + 1 * Kp * Fp)   # weight, single-buffered (pl.Buffered(1))
        ws += 4 * (Fp               # bias (f32)
                   + 2 * tm * Fp)   # output tile, double-buffered (f32)
        ws += 4 * (Nk * Fp if xw_first else tm * Kp)   # f32 intermediate
        return ws

    # Largest row tile (multiple of 8 sublanes) that fits the VMEM budget.
    tm = min(_round_up(N, 8), _round_up(row_tile, 8))
    while tm > 8 and working_set(tm) > vmem_budget_bytes:
        tm = max(8, _round_up(tm // 2, 8))

    # Megacore heuristic: guarantee >=2 row tiles so the ("parallel","parallel")
    # grid can feed both v7x TensorCores even when the batch is 1.
    if _round_up(N, tm) // tm < 2 and N >= 16:
        tm = min(tm, _round_up(-(-N // 2), 8))

    Nr = _round_up(N, tm)

    adj_p = _pad_to(adj.astype(compute_dtype).reshape((-1, N, N)),
                    (adj.shape[0] if batched_adj else 1, Nr, Nk))
    w_p = _pad_to(weight.astype(compute_dtype), (Kp, Fp))
    b_p = None
    if bias is not None:
        b_p = _pad_to(bias.astype(jnp.float32).reshape(1, F), (1, Fp))

    vmem_limit = int(min(max(2 * working_set(tm), 32 * 2**20), 48 * 2**20))

    return dict(adj_p=adj_p, w_p=w_p, b_p=b_p,
                n=N, k=K, f=F, nk=Nk, kp=Kp, fp=Fp, nr=Nr, tm=tm,
                batched_adj=batched_adj, xw_first=xw_first,
                compute_dtype=compute_dtype, vmem_limit=vmem_limit)


def graph_conv_forward(x, params):
    """out = adj @ x @ weight (+ bias);  x: (B, N, num_in) or (N, num_in)."""
    p = params
    squeeze = x.ndim == 2
    if squeeze:
        x = x[None]
    B, N, K = x.shape
    assert N == p["n"] and K == p["k"], "x shape mismatch with prepared params"
    if p["batched_adj"]:
        assert p["adj_p"].shape[0] == B, "batched adjacency batch mismatch"

    Nk, Kp, Fp, Nr, TM = p["nk"], p["kp"], p["fp"], p["nr"], p["tm"]
    x_p = _pad_to(x.astype(p["compute_dtype"]), (B, Nk, Kp))

    adj_map = (lambda b, i: (b, i, 0)) if p["batched_adj"] else (lambda b, i: (0, i, 0))
    has_bias = p["b_p"] is not None

    in_specs = [
        pl.BlockSpec((None, TM, Nk), adj_map),
        pl.BlockSpec((None, Nk, Kp), lambda b, i: (b, 0, 0)),
        # Grid-invariant weight / bias: single-buffered to halve their VMEM use.
        pl.BlockSpec((Kp, Fp), lambda b, i: (0, 0), pipeline_mode=pl.Buffered(1)),
    ]
    args = [p["adj_p"], x_p, p["w_p"]]
    if has_bias:
        in_specs.append(pl.BlockSpec((1, Fp), lambda b, i: (0, 0),
                                     pipeline_mode=pl.Buffered(1)))
        args.append(p["b_p"])

    bc = jnp.dtype(p["compute_dtype"]).itemsize
    row_tiles = Nr // TM
    if p["xw_first"]:
        flops = 2 * B * (row_tiles * Nk * Kp * Fp + Nr * Nk * Fp)
    else:
        flops = 2 * B * (Nr * Nk * Kp + Nr * Kp * Fp)
    bytes_accessed = (p["adj_p"].size * bc + x_p.size * bc + p["w_p"].size * bc
                      + (p["b_p"].size * 4 if has_bias else 0)
                      + B * Nr * Fp * 4)

    out = pl.pallas_call(
        functools.partial(_graph_conv_kernel, p["xw_first"], has_bias),
        out_shape=jax.ShapeDtypeStruct((B, Nr, Fp), jnp.float32),
        grid=(B, row_tiles),
        in_specs=in_specs,
        out_specs=pl.BlockSpec((None, TM, Fp), lambda b, i: (b, i, 0)),
        compiler_params=pltpu.CompilerParams(
            dimension_semantics=("parallel", "parallel"),
            vmem_limit_bytes=p["vmem_limit"]),
        cost_estimate=pl.CostEstimate(flops=flops, transcendentals=0,
                                      bytes_accessed=bytes_accessed),
    )(*args)

    out = out[:, :N, :p["f"]]
    if squeeze:
        out = out[0]
    return out


def graph_convolution(x, adj, weight, bias=None, **kwargs):
    """One-shot convenience wrapper (re-pads the constants every call).
    For repeated calls, use prepare_graph_conv() once + graph_conv_forward()."""
    return graph_conv_forward(x, prepare_graph_conv(weight, adj, bias, **kwargs))


if __name__ == "__main__":
    key = jax.random.PRNGKey(0)
    k_adj, k_x, k_w, k_w2 = jax.random.split(key, 4)

    batch, nodes, num_in, num_out = 2, 16, 32, 64
    x = jax.random.normal(k_x, (batch, nodes, num_in), jnp.float32)
    adj = jax.random.normal(k_adj, (nodes, nodes), jnp.float32)
    # xavier_normal_ weight init, zeros bias — as in the PyTorch module
    std = math.sqrt(2.0 / (num_in + num_out))
    weight = std * jax.random.normal(k_w, (num_in, num_out), jnp.float32)
    bias = jnp.zeros((num_out,), jnp.float32)

    ref = jnp.einsum("nm,bmk->bnk", adj, x) @ weight

    # 1) Default path: bias=False (module default), bf16 MXU operands, f32 accum.
    params = prepare_graph_conv(weight, adj, bias=None)
    fwd = jax.jit(lambda xx: graph_conv_forward(xx, params))
    out = fwd(x)
    jax.block_until_ready(out)
    assert out.shape == (batch, nodes, num_out)
    assert jnp.allclose(out, ref, atol=5e-2, rtol=5e-2), "bf16 path mismatch"

    # 2) Exact-parity path: f32 operands, bias=True.
    params_f32 = prepare_graph_conv(weight, adj, bias=bias,
                                    compute_dtype=jnp.float32)
    out_f32 = jax.jit(lambda xx: graph_conv_forward(xx, params_f32))(x)
    jax.block_until_ready(out_f32)
    assert jnp.allclose(out_f32, ref + bias, atol=1e-4, rtol=1e-4), "f32 path mismatch"

    # 3) num_out < num_in -> x@w-first association; also exercises batched adj.
    num_out2 = 16
    weight2 = std * jax.random.normal(k_w2, (num_in, num_out2), jnp.float32)
    adj_b = jnp.stack([adj, adj + 0.5])
    params_xw = prepare_graph_conv(weight2, adj_b, bias=None,
                                   compute_dtype=jnp.float32)
    out_xw = jax.jit(lambda xx: graph_conv_forward(xx, params_xw))(x)
    jax.block_until_ready(out_xw)
    ref_xw = jnp.einsum("bnm,bmk->bnk", adj_b, x) @ weight2
    assert jnp.allclose(out_xw, ref_xw, atol=1e-4, rtol=1e-4), "xw-first path mismatch"

    print("KERNEL_OK")
</pallas_src>

<mosaic_0001>
module attributes {stable_mosaic.version = 11 : i64} {
  func.func @_graph_conv_kernel(%arg0: i32, %arg1: i32, %arg2: memref<1x8x128xbf16, #tpu.memory_space<vmem>>, %arg3: memref<1x128x128xbf16, #tpu.memory_space<vmem>>, %arg4: memref<128x128xbf16, #tpu.memory_space<vmem>>, %arg5: memref<1x8x128xf32, #tpu.memory_space<vmem>>) attributes {dimension_semantics = [#tpu.dimension_semantics<parallel>, #tpu.dimension_semantics<parallel>], iteration_bounds = array<i64: 2, 2>, scalar_prefetch = 0 : i64, scratch_operands = 0 : i64, tpu.core_type = #tpu.core_type<tc>, window_params = [{transform_indices = @transform_0, window_bounds = array<i64: 1, 8, 128>}, {transform_indices = @transform_1, window_bounds = array<i64: 1, 128, 128>}, {pipeline_mode = #tpu.pipeline_mode<synchronous>, transform_indices = @transform_2, window_bounds = array<i64: 128, 128>}, {transform_indices = @transform_3, window_bounds = array<i64: 1, 8, 128>}]} {
    %c0 = arith.constant 0 : index
    %c0_0 = arith.constant 0 : index
    %c0_1 = arith.constant 0 : index
    %0 = vector.load %arg2[%c0, %c0_0, %c0_1] : memref<1x8x128xbf16, #tpu.memory_space<vmem>>, vector<1x8x128xbf16>
    %1 = vector.shape_cast %0 : vector<1x8x128xbf16> to vector<8x128xbf16>
    %c0_2 = arith.constant 0 : index
    %c0_3 = arith.constant 0 : index
    %c0_4 = arith.constant 0 : index
    %2 = vector.load %arg3[%c0_2, %c0_3, %c0_4] : memref<1x128x128xbf16, #tpu.memory_space<vmem>>, vector<1x128x128xbf16>
    %3 = vector.shape_cast %2 : vector<1x128x128xbf16> to vector<128x128xbf16>
    %cst = arith.constant dense<0.000000e+00> : vector<8x128xf32>
    %4 = tpu.matmul %1, %3, %cst {dimension_numbers = #tpu.dot_dimension_numbers<[1], [0], [0], [1], [0, 0, 1, 1], [], []>} : vector<8x128xbf16>, vector<128x128xbf16>, vector<8x128xf32> -> vector<8x128xf32>
    %5 = arith.truncf %4 : vector<8x128xf32> to vector<8x128xbf16>
    %c0_5 = arith.constant 0 : index
    %c0_6 = arith.constant 0 : index
    %6 = vector.load %arg4[%c0_5, %c0_6] : memref<128x128xbf16, #tpu.memory_space<vmem>>, vector<128x128xbf16>
    %cst_7 = arith.constant dense<0.000000e+00> : vector<8x128xf32>
    %7 = tpu.matmul %5, %6, %cst_7 {dimension_numbers = #tpu.dot_dimension_numbers<[1], [0], [0], [1], [0, 0, 1, 1], [], []>} : vector<8x128xbf16>, vector<128x128xbf16>, vector<8x128xf32> -> vector<8x128xf32>
    %c0_8 = arith.constant 0 : index
    %c0_9 = arith.constant 0 : index
    %c0_10 = arith.constant 0 : index
    %8 = vector.load %arg5[%c0_8, %c0_9, %c0_10] : memref<1x8x128xf32, #tpu.memory_space<vmem>>, vector<1x8x128xf32>
    %9 = vector.shape_cast %8 : vector<1x8x128xf32> to vector<8x128xf32>
    %10 = vector.shape_cast %7 : vector<8x128xf32> to vector<1x8x128xf32>
    tpu.vector_store %arg5[%c0_8, %c0_9, %c0_10], %10 {strides = array<i32>} : memref<1x8x128xf32, #tpu.memory_space<vmem>>, vector<1x8x128xf32>,
    return
  }
  func.func @transform_0(%arg0: i32, %arg1: i32) -> (i32, i32, i32) {
    %c0_i32 = arith.constant 0 : i32
    %c0_i32_0 = arith.constant 0 : i32
    %c0_i32_1 = arith.constant 0 : i32
    return %c0_i32, %arg1, %c0_i32_0 : i32, i32, i32
  }
  func.func @transform_1(%arg0: i32, %arg1: i32) -> (i32, i32, i32) {
    %c0_i32 = arith.constant 0 : i32
    %c0_i32_0 = arith.constant 0 : i32
    %c0_i32_1 = arith.constant 0 : i32
    return %arg0, %c0_i32, %c0_i32_0 : i32, i32, i32
  }
  func.func @transform_2(%arg0: i32, %arg1: i32) -> (i32, i32) {
    %c0_i32 = arith.constant 0 : i32
    %c0_i32_0 = arith.constant 0 : i32
    %c0_i32_1 = arith.constant 0 : i32
    return %c0_i32, %c0_i32_0 : i32, i32
  }
  func.func @transform_3(%arg0: i32, %arg1: i32) -> (i32, i32, i32) {
    %c0_i32 = arith.constant 0 : i32
    %c0_i32_0 = arith.constant 0 : i32
    return %arg0, %arg1, %c0_i32 : i32, i32, i32
  }
}

</mosaic_0001>

<bundles_post_ra>
// kernel: _lambda_.1
= control target key start
LH: loop header
LB: loop body
LE: loop exit
PB: predicated region body
PF: predicated region fallthrough
CT: control target
= control target key end

     0   :  { %8 = vsyncpa [#allocation3], 0  ;;  %s900_s0 = inlined_call_operand.vmem [shape: bf16[1,16,128], index: 0, kind: input, shape index: {}]   ;;  %s901_s1 = inlined_call_operand.vmem [shape: bf16[2,128,128], index: 1, kind: input, shape index: {}]   ;;  %s902_s2 = inlined_call_operand.vmem [shape: bf16[128,128], index: 2, kind: input, shape index: {}]   ;;  %s903_s3 = inlined_call_operand.hbm [shape: f32[2,16,128], index: 3, kind: output, shape index: {}]  }
   0x1   :  { %10 = vsyncpa [#allocation3 + $0x1], 0  ;;  %s741_s12 = smov 0   ;;  %s743_s13 = smov 0  }
   0x2   :  { %s745_s14 = smov 0   ;;  %s747_s15 = smov 0  }
   0x3   :  { %s749_s16 = smov 0   ;;  %s751_s17 = smov 0  }
   0x4   :  { %s753_s18 = smov 0   ;;  %s755_s19 = smov 0  }
   0x5 LB: > { %s459_s20 = sadd.s32 4294967295, %s719_s19   ;;  %s460_s21 = sadd.s32 4294967294, %s719_s19   ;;  %s719_s19 = sphi %s755_s19, %s16_s19   ;;  %s715_s18 = sphi %s753_s18, %s912_s18   ;;  %s711_s17 = sphi %s751_s17, %s911_s17   ;;  %s707_s16 = sphi %s749_s16, %s910_s16   ;;  %s703_s15 = sphi %s747_s15, %s909_s15   ;;  %s699_s14 = sphi %s745_s14, %s908_s14   ;;  %s695_s13 = sphi %s743_s13, %s907_s13   ;;  %s691_s12 = sphi %s741_s12, %s906_s12  }
   0x6   : > { %s25_s22 = sadd.s32 1, %s711_s17  ;;  %s28_s23 = sadd.s32 1, %s715_s18 }
   0x7   : > { %p26_p0 = scmp.ge.s32.totalorder %s25_s22, 2  ;;  %p120_p1 = scmp.ne.s32.totalorder %s699_s14, %s695_s13 }
   0x8   : > { %p121_p2 = scmp.eq.s32.totalorder %s459_s20, 3  ;;  %p126_p5 = scmp.ne.s32.totalorder %s695_s13, %s691_s12 }
   0x9   : > { %s914_s22 = smov (%p26_p0, %s25_s22), 0  ;;  %s916_s23 = smov (!%p26_p0, %s28_s23), %s715_s18 }
   0xa   : > { %s106_s24 = ssub.s32 %s711_s17, %s914_s22  ;;  %p792_p3 = por %p121_p2, %p120_p1 }
   0xb   : > { %p30_p4 = scmp.ge.s32.totalorder %s916_s23, 2  ;;  %p127_p6 = scmp.eq.s32.totalorder %s460_s21, 3 }
   0xc   : > { %p463_p7 = scmp.ge.s32.totalorder %s719_s19, 1  ;;  %p163_p9 = scmp.lt.s32.totalorder %s719_s19, 5 }
   0xd   : > { %s918_s23 = smov (%p30_p4, %s916_s23), 0  ;;  %p801_p8 = por %p127_p6, %p126_p5 }
   0xe   : > { %s105_s27 = ssub.s32 %s715_s18, %s918_s23  ;;  %s110_s28 = sadd.s32 1, %s699_s14 }
   0xf   : > { %s107_s29 = sor.u32 %s106_s24, %s105_s27  ;;  %p164_p10 = pnand %p463_p7, %p163_p9 }
  0x10   : > { %p108_p11 = scmp.eq.s32.totalorder %s107_s29, 0  ;;  %p195_p12 = scmp.lt.s32.totalorder (!%p164_p10), %s707_s16, 1 }
  0x11   : > { %167 = sbr.rel (%p164_p10) target bundleno = 320 (0x140), region = 32  ;;  %p191_p13 = scmp.lt.s32.totalorder (!%p164_p10), %s703_s15, 1 }
  0x12   : > { %s810_s30 = scalar_select %p108_p11, %s699_s14, %s110_s28  }
  0x13   : > { %s533_s29 = sshll.u32 (!%p164_p10), %s707_s16, 1 }
  0x16   : > { %s196_s4 = scalar_select %p195_p12, %s707_s16, 1  ;;  %v553_v2 = vld [vmem:[%s902_s2 + $0x38] sm:$0xff]  ;;  %v552_v3 = vld [vmem:[%s902_s2 + $0x30] sm:$0xff]  ;;  %v551_v5 = vld [vmem:[%s902_s2 + $0x28] sm:$0xff] }
  0x17   : > { %343 = vmatpush.bf16.msra.mxu1 %v553_v2  ;;  %v550_v7 = vld [vmem:[%s902_s2 + $0x20] sm:$0xff]  ;;  %v549_v9 = vld [vmem:[%s902_s2 + $0x18] sm:$0xff]  ;;  %v548_v11 = vld [vmem:[%s902_s2 + $0x10] sm:$0xff] }
  0x18   : > { %s537_s5 = sshll.u32 %s196_s4, 6  ;;  %v547_v13 = vld [vmem:[%s902_s2 + $0x8] sm:$0xff]  ;;  %v546_v16 = vld [vmem:[%s902_s2] sm:$0xff]  ;;  %s368_s4 = sadd.s32 %s703_s15, %s533_s29 }
  0x19   : > { %s817_s8 = scalar_lea.vmem %s901_s1, %s537_s5  ;;  %s645_s29 = scalar_lea.hbm %s903_s3, 32 }
  0x1a   : > { %v545_v0 = vld [vmem:[%s817_s8 + $0x38] sm:$0xff]  ;;  %v544_v1 = vld [vmem:[%s817_s8 + $0x30] sm:$0xff]  ;;  %v543_v4 = vld [vmem:[%s817_s8 + $0x28] sm:$0xff]  ;;  %s192_s5 = scalar_select %p191_p13, %s703_s15, 1 }
  0x1b   : > { %265 = vmatpush.bf16.msra.mxu0 %v545_v0  ;;  %344 = vmatpush.bf16.msra.mxu1 %v552_v3  ;;  %v542_v6 = vld [vmem:[%s817_s8 + $0x20] sm:$0xff]  ;;  %v541_v8 = vld [vmem:[%s817_s8 + $0x18] sm:$0xff]  ;;  %v540_v10 = vld [vmem:[%s817_s8 + $0x10] sm:$0xff] }
  0x1c   : > { %v539_v12 = vld [vmem:[%s817_s8 + $0x8] sm:$0xff]  ;;  %s465_s9 = sshll.u32 %s192_s5, 2  ;;  %v538_v14 = vld [vmem:[%s817_s8] sm:$0xff]  ;;  %s188_s8 = sand.u32 1, %s695_s13  }
  0x1d   : > { %s194_s24 = scalar_lea.vmem %s900_s0, %s465_s9  ;;  %s534_s5 = sshll.u32 %s368_s4, 3 }
  0x1e   : > { %v200_v15 = vld [vmem:[%s194_s24] sm:$0xf]  ;;  %s464_s6 = sshll.u32 %s188_s8, 3  ;;  %s370_s10 = scalar_lea.hbm %s903_s3, %s534_s5 }
  0x1f   : > { %266 = vmatpush.bf16.msra.mxu0 %v544_v1  ;;  %345 = vmatpush.bf16.msra.mxu1 %v551_v5  ;;  %s190_s11 = scalar_lea.vmem [#allocation2], %s464_s6  ;;  %s374_s21 = sshll.u32 %s370_s10, 4  ;;  %s375_s21 = int_to_ptr.hbm [resolvable:$true] %s374_s21 }
  0x20   : > { %s372_s20 = sshll.u32 %s190_s11, 4  ;;  %s358_s24 = scalar_lea.sflag [#allocation3], %s188_s8  ;;  %s373_s20 = int_to_ptr.vmem [resolvable:$true] %s372_s20 }
  0x21   : > { %s639_s27 = sshra.s32 %s375_s21, 4  ;;  %s640_s27 = int_to_ptr.hbm [resolvable:$true] %s639_s27 }
  0x22   : > { %s641_s16 = scalar_lea.hbm %s640_s27, 8  ;;  %p646_p4 = scmp.lt.s32.totalorder %s640_s27, %s903_s3 }
  0x23   : > { %267 = vmatpush.bf16.msra.mxu0 %v543_v4  ;;  %346 = vmatpush.bf16.msra.mxu1 %v550_v7  ;;  %p642_p0 = scmp.ne.s32.totalorder %s640_s27, %s641_s16  ;;  %p647_p5 = scmp.lt.s32.totalorder %s645_s29, %s641_s16 }
  0x25   : > { %p643_p1 = pnand %p642_p0, %p792_p3  ;;  %p648_p6 = por %p647_p5, %p646_p4 }
  0x27   : > { %268 = vmatpush.bf16.msra.mxu0 %v542_v6  ;;  %347 = vmatpush.bf16.msra.mxu1 %v549_v9  ;;  %p644_p2 = pneg %p643_p1 }
  0x29   : > { %p649_p7 = pnand %p648_p6, %p644_p2 }
  0x2b   : > { %269 = vmatpush.bf16.msra.mxu0 %v541_v8  ;;  %348 = vmatpush.bf16.msra.mxu1 %v548_v11 }
  0x2f   : > { %270 = vmatpush.bf16.msra.mxu0 %v540_v10  ;;  %349 = vmatpush.bf16.msra.mxu1 %v547_v13 }
  0x33   : > { %271 = vmatpush.bf16.msra.mxu0 %v539_v12  ;;  %350 = vmatpush.bf16.msra.mxu1 %v546_v16 }
  0x37   : > { %272 = vmatpush.bf16.msra.mxu0 %v538_v14 }
  0x3a   : > { %273 = vmatmul.bf16.vlgmr.msra.gmra.mxu0 %v200_v15 }
  0xb7   : > { %v274_v17 = vpop.f32.mrf.mxu0 }
  0xb8   : > { %v278_v18 = vpack.c.bf16 %v274_v17, %v274_v17 }
  0xba   : > { %351 = vmatmul.bf16.vlgmr.msra.gmra.mxu1 %v278_v18 }
  0xbf   : > { %v276_v19 = vpop.f32.mrf.mxu0 }
 0x137   : > { %v352_v20 = vpop.f32.mrf.mxu1 }
 0x138   : > { %356 = vst [vmem:[%s190_s11] sm:$0xff] %v352_v20 }
 0x139   : > { %652 = shalt.err (!%p649_p7)
}
 0x13a   : > { %554 = dma.vmem_to_hbm [thread:$0]  (%p792_p3), %s373_s20, 128, %s375_s21, %s358_s24  }
 0x13f   : > { %v354_v21 = vpop.f32.mrf.mxu1 }
 0x140 PF: > { %p560_p9 = scmp.ge.s32.totalorder %s719_s19, 2  ;;  %s386_s8 = sand.u32 1, %s691_s12  }
 0x141   : > { %s387_s6 = scalar_lea.sflag [#allocation3], %s386_s8 }
 0x142   : > { %p557_p10 = pnand %p560_p9, %p801_p8 }
 0x144   : > { %p558_p11 = pneg %p557_p10 }
 0x146   : > { %686 = dma.done.wait (%p558_p11), %s387_s6, 128  }
 0x147   : > { %688 = vsyncadd (%p558_p11), %s387_s6, 4294967168  ;;  %s16_s19 = sadd.s32 1, %s719_s19   ;;  %s906_s12 = smov %s695_s13 }
 0x148   : > { %p13_p12 = scmp.ge.s32.totalorder %s16_s19, 6   ;;  %s907_s13 = smov %s699_s14 }
 0x149   : > { %s908_s14 = smov %s810_s30  ;;  %s909_s15 = smov %s711_s17 }
 0x14a   : > { %s910_s16 = smov %s715_s18  ;;  %s911_s17 = smov %s914_s22 }
 0x14b   : > { %s912_s18 = smov %s918_s23  ;;  %15 = sbr.rel (!%p13_p12) target bundleno = 5 (0x5), region = 70 }
 0x150   :  { %393 = vsyncpa [#allocation3], 1 }
 0x151   :  { %395 = vsyncpa [#allocation3 + $0x1], 1 }

</bundles_post_ra>
